<compile_context>
chip_gen: v7x
topology: tpu7x:2x2x1
jax: 0.10.0
libtpu: 0.0.40
codegen_flags: <defaults>
</compile_context>

<pallas_src>
import math

import jax
import jax.numpy as jnp
from jax.experimental import pallas as pl
from jax.experimental.pallas import tpu as pltpu


def calculate_pe(d_model: int, max_len: int) -> jnp.ndarray:
    """Sinusoidal positional-encoding table, shape (1, max_len, d_model), float32."""
    position = jnp.arange(0, max_len, dtype=jnp.float32)[:, None]            # (max_len, 1)
    div_term = jnp.exp(
        jnp.arange(0, d_model, 2, dtype=jnp.float32) * (-math.log(10000.0) / d_model)
    )                                                                         # (d_model/2,)
    angles = position * div_term                                              # (max_len, d_model/2)
    # interleave: pe[:, 0::2] = sin, pe[:, 1::2] = cos
    pe = jnp.stack([jnp.sin(angles), jnp.cos(angles)], axis=-1).reshape(max_len, d_model)
    return pe[None, :, :]


# ---------------------------------------------------------------------------
# kernel: elementwise add; pe block (1, tn) broadcasts over the batch sublanes
# ---------------------------------------------------------------------------
def _add_pe_kernel(x_ref, pe_ref, o_ref):
    o_ref[...] = (x_ref[...] + pe_ref[...]).astype(o_ref.dtype)


# ---------------------------------------------------------------------------
# tile sizing: keep double-buffered x + out + pe blocks under a VMEM budget
# ---------------------------------------------------------------------------
_VMEM_BUDGET_BYTES = 12 * 1024 * 1024   # safely under the 16 MiB default scoped VMEM on v5e


def _sublane_multiple(dtype) -> int:
    # native sublane tile: 8 (4-byte), 16 (2-byte), 32 (1-byte dtypes)
    return max(8, 32 // jnp.dtype(dtype).itemsize)


def _choose_tiles(rows: int, cols: int, dtype):
    """Pick (row_tile, col_tile) for the flattened (B, S*D) view.

    Blocks resident in VMEM: x (2 buffers) + out (2 buffers) of (row_tile, col_tile),
    plus pe (2 buffers) of (1, col_tile) padded to one sublane tile.
    """
    isz = jnp.dtype(dtype).itemsize
    m = _sublane_multiple(dtype)
    rows_pad = ((rows + m - 1) // m) * m

    # Preferred: full-height blocks (whole batch per block, fewest grid steps,
    # pe streamed exactly once).
    bytes_per_col = isz * (4 * rows_pad + 2 * m)
    tn_raw = _VMEM_BUDGET_BYTES // bytes_per_col
    if tn_raw >= cols:
        return rows, cols
    if tn_raw >= 128:
        return rows, (tn_raw // 128) * 128

    # Very tall inputs: fix a lane-dense column tile and size the row tile from budget.
    if cols >= 512:
        tn = 512
    elif cols >= 128:
        tn = (cols // 128) * 128
    else:
        tn = cols
    pe_bytes = isz * 2 * m * tn
    tr = (_VMEM_BUDGET_BYTES - pe_bytes) // (isz * 4 * tn)
    tr = max(m, (tr // m) * m)
    tr = rows if tr >= rows else tr
    return tr, tn


# ---------------------------------------------------------------------------
# forward
# ---------------------------------------------------------------------------
def _positional_encoding_forward(x: jnp.ndarray, pe: jnp.ndarray) -> jnp.ndarray:
    """x: (B, S, D); pe: (1, max_len, D). Returns x + pe[:, :S, :]."""
    b, seq_len, d_model = x.shape
    cols = seq_len * d_model

    # Flatten (S, D) -> S*D: lane-dense output slab for any d_model (free reshape).
    x2 = x.reshape(b, cols)
    pe2 = pe[:, :seq_len, :].astype(x.dtype).reshape(1, cols)

    tr, tn = _choose_tiles(b, cols, x.dtype)
    n_c = pl.cdiv(cols, tn)
    n_r = pl.cdiv(b, tr)

    out2 = pl.pallas_call(
        _add_pe_kernel,
        out_shape=jax.ShapeDtypeStruct((b, cols), x.dtype),
        grid_spec=pltpu.PrefetchScalarGridSpec(
            num_scalar_prefetch=0,
            # row axis innermost -> pe's block index is constant along it, so the
            # pipeline elides redundant pe re-fetches.
            grid=(n_c, n_r),
            in_specs=[
                pl.BlockSpec((tr, tn), lambda c, r: (r, c)),   # x
                pl.BlockSpec((1, tn), lambda c, r: (0, c)),    # pe (broadcast over rows)
            ],
            out_specs=pl.BlockSpec((tr, tn), lambda c, r: (r, c)),
        ),
        compiler_params=pltpu.CompilerParams(
            dimension_semantics=("parallel", "parallel")),
        input_output_aliases={0: 0},                           # in-place add into x's buffer
    )(x2, pe2)
    return out2.reshape(b, seq_len, d_model)


# donate x so the in-place alias holds all the way to the jit boundary (no extra HBM buffer)
positional_encoding_forward = jax.jit(_positional_encoding_forward, donate_argnums=(0,))


if __name__ == "__main__":
    key = jax.random.PRNGKey(0)

    def run_case(b, s, d, max_len):
        kx = jax.random.fold_in(key, d)
        x = jax.random.normal(kx, (b, s, d), dtype=jnp.float32)
        pe = calculate_pe(d_model=d, max_len=max_len)
        # materialize the reference BEFORE the donated kernel call consumes x
        ref = jax.block_until_ready(x + pe[:, :s, :])
        out = jax.block_until_ready(positional_encoding_forward(x, pe))
        assert out.shape == (b, s, d)
        assert jnp.allclose(out, ref, atol=1e-6), f"mismatch vs reference (D={d})"

    # narrow-D case (D=32): flattened columns = 256, single lane-dense block
    run_case(b=2, s=8, d=32, max_len=16)
    # module's default d_model=384 case
    run_case(b=2, s=8, d=384, max_len=16)

    print("KERNEL_OK")
</pallas_src>

<mosaic_0001>
module attributes {stable_mosaic.version = 11 : i64} {
  func.func @_add_pe_kernel(%arg0: i32, %arg1: i32, %arg2: memref<2x256xf32, #tpu.memory_space<vmem>>, %arg3: memref<1x256xf32, #tpu.memory_space<vmem>>, %arg4: memref<2x256xf32, #tpu.memory_space<vmem>>) attributes {dimension_semantics = [#tpu.dimension_semantics<parallel>, #tpu.dimension_semantics<parallel>], iteration_bounds = array<i64: 1, 1>, scalar_prefetch = 0 : i64, scratch_operands = 0 : i64, tpu.core_type = #tpu.core_type<tc>, window_params = [{transform_indices = @transform_0, window_bounds = array<i64: 2, 256>}, {transform_indices = @transform_1, window_bounds = array<i64: 1, 256>}, {transform_indices = @transform_2, window_bounds = array<i64: 2, 256>}]} {
    %c0 = arith.constant 0 : index
    %c0_0 = arith.constant 0 : index
    %0 = vector.load %arg2[%c0, %c0_0] : memref<2x256xf32, #tpu.memory_space<vmem>>, vector<2x256xf32>
    %c0_1 = arith.constant 0 : index
    %c0_2 = arith.constant 0 : index
    %1 = vector.load %arg3[%c0_1, %c0_2] : memref<1x256xf32, #tpu.memory_space<vmem>>, vector<1x256xf32>
    %2 = vector.broadcast %1 : vector<1x256xf32> to vector<2x256xf32>
    %3 = arith.addf %0, %2 : vector<2x256xf32>
    %c0_3 = arith.constant 0 : index
    %c0_4 = arith.constant 0 : index
    %4 = vector.load %arg4[%c0_3, %c0_4] : memref<2x256xf32, #tpu.memory_space<vmem>>, vector<2x256xf32>
    tpu.vector_store %arg4[%c0_3, %c0_4], %3 {strides = array<i32>} : memref<2x256xf32, #tpu.memory_space<vmem>>, vector<2x256xf32>,
    return
  }
  func.func @transform_0(%arg0: i32, %arg1: i32) -> (i32, i32) {
    %c0_i32 = arith.constant 0 : i32
    return %arg1, %arg0 : i32, i32
  }
  func.func @transform_1(%arg0: i32, %arg1: i32) -> (i32, i32) {
    %c0_i32 = arith.constant 0 : i32
    %c0_i32_0 = arith.constant 0 : i32
    return %c0_i32, %arg0 : i32, i32
  }
  func.func @transform_2(%arg0: i32, %arg1: i32) -> (i32, i32) {
    %c0_i32 = arith.constant 0 : i32
    return %arg1, %arg0 : i32, i32
  }
}

</mosaic_0001>

<bundles_post_ra>
// kernel: _positional_encoding_forward.1
= control target key start
LH: loop header
LB: loop body
LE: loop exit
PB: predicated region body
PF: predicated region fallthrough
CT: control target
= control target key end

     0   :  { %v14_v0 = vlaneseq  ;;  %v38_v1 = vmov 1983009808   ;;  %s63_s1 = inlined_call_operand.vmem [shape: f32[1,256], index: 1, kind: input, shape index: {}]   ;;  %s64_s0 = inlined_call_operand.vmem [shape: f32[2,256], index: 0, kind: input, shape index: {}, may-alias: {0,2}]   ;;  %s65_s2 = inlined_call_operand.vmem [shape: f32[2,256], index: 2, kind: output, shape index: {}, may-alias: {0,2}]  }
   0x1   :  { %v24_v2 = vunpack.c.l.s4 %v38_v1  ;;  %v12_v4 = vld [vmem:[%s63_s1] sm:$0x3] }
   0x2   :  { %v15_v3 = vshrl.u32 %v14_v0, 7  ;;  %v11_v12 = vld [vmem:[%s64_s0] sm:$0xf] }
   0x3   :  { %v25_v5 = vunpack.c.0.s8 %v24_v2 }
   0x4   :  { %v16_v6 = vsub.s32 0, %v15_v3  ;;  %v20_v7 = vsub.s32 1, %v15_v3 }
   0x5   :  { %v28_v10 = vsub.s32 %v25_v5, %v15_v3 }
   0x6   :  { %v17_v8 = vrot.slane %v12_v4, %v16_v6  ;;  %v21_v9 = vrot.slane %v12_v4, %v20_v7 }
   0x8   :  { %v22_v11 = vcombine.low %v17_v8, %v21_v9 }
   0xa   :  { %v29_v13 = vrot.slane %v22_v11, %v28_v10 }
   0xc   :  { %v31_v14 = vadd.f32 %v29_v13, %v11_v12 }
   0xe   :  { %32 = vst [vmem:[%s65_s2] sm:$0xf] %v31_v14 }

</bundles_post_ra>
